<compile_context>
chip_gen: v6e
topology: v6e:2x2x1
jax: 0.10.0
libtpu: 0.0.40
codegen_flags: <defaults>
</compile_context>

<pallas_src>
import jax
import jax.numpy as jnp
from jax.experimental import pallas as pl
from jax.experimental.pallas import tpu as pltpu


def _attention_kernel(x_ref, w1_ref, b1_ref, w2_ref, b2_ref, o_ref):
    # x_ref : (1, C, T)   spatial tile of one image (channels on sublanes)
    # w1_ref: (C2, C)     conv1 weight (1x1 conv == channel matmul), resident
    # b1_ref: (C2, 1)     conv1 bias (broadcasts over lanes)
    # w2_ref: (1, C2)     conv2 weight, resident
    # b2_ref: (1, 1)      conv2 bias
    # o_ref : (1, C, T)
    x = x_ref[0]  # (C, T) in the input's native dtype (no full-tile upcast)

    # conv1 (1x1) + ReLU: MXU matmul with f32 accumulation.
    h = jnp.dot(w1_ref[...], x, preferred_element_type=jnp.float32)
    h = jnp.maximum(h + b1_ref[...], 0.0)                      # (C2, T) f32

    # conv2 (1x1) + sigmoid -> per-pixel attention row.
    a = jnp.dot(w2_ref[...], h, preferred_element_type=jnp.float32)
    a = jax.nn.sigmoid(a + b2_ref[...])                        # (1, T) f32

    # Gate the input: cast the small attention row down instead of upcasting
    # the whole (C, T) tile (keeps vreg pressure low for bf16 activations).
    o_ref[0] = x * a.astype(x.dtype)


def attention_module(x_nchw, w1, b1, w2, b2, *, tile_hw=1024,
                     vmem_limit_bytes=32 << 20, donate_x=False):
    """NCHW 1x1-conv attention gate.

    x_nchw: (N, C, H, W); w1: (C2, C) (PyTorch OIHW conv weight with the 1x1
    spatial dims squeezed); b1: (C2,); w2: (1, C2); b2: (1,).
    Returns (N, C, H, W)."""
    N, C, H, W = x_nchw.shape
    C2 = w1.shape[0]
    HW = H * W
    dt = x_nchw.dtype
    itemsize = jnp.dtype(dt).itemsize

    # Lane-dense spatial tile: multiple of 128, capped so the double-buffered
    # in+out working set (~4 * C * tile * itemsize bytes) stays well under the
    # scoped VMEM limit (v7x only has 64 MiB physical / 32 MiB default scoped).
    budget = 24 << 20
    t = min(tile_hw, HW + (-HW) % 128)
    t = max(128, (t // 128) * 128)
    while t > 128 and 4 * C * t * itemsize > budget:
        t = max(128, (t // 2 // 128) * 128)
    tile_hw = t

    # NCHW -> (N, C, HW): a pure reshape -- no transpose, no extra HBM pass.
    x3 = x_nchw.reshape(N, C, HW)
    pad = (-HW) % tile_hw
    if pad:
        x3 = jnp.pad(x3, ((0, 0), (0, 0), (0, pad)))
    HWp = HW + pad

    # Weights are already in W @ X orientation for NCHW; keep activations'
    # dtype for the MXU operands, biases in f32 (added to the f32 accumulator).
    w1_k = w1.astype(dt)                         # (C2, C)
    b1_k = b1.reshape(C2, 1).astype(jnp.float32)
    w2_k = w2.astype(dt)                         # (1, C2)
    b2_k = b2.reshape(1, 1).astype(jnp.float32)

    grid = (N, HWp // tile_hw)

    out3 = pl.pallas_call(
        _attention_kernel,
        out_shape=jax.ShapeDtypeStruct((N, C, HWp), dt),
        grid_spec=pltpu.PrefetchScalarGridSpec(
            num_scalar_prefetch=0,
            grid=grid,
            in_specs=[
                pl.BlockSpec((1, C, tile_hw), lambda n, j: (n, 0, j)),  # x slab
                # Constant index_maps => weights/biases stay resident in VMEM
                # (DMA'd once, not per grid step).
                pl.BlockSpec((C2, C), lambda n, j: (0, 0)),
                pl.BlockSpec((C2, 1), lambda n, j: (0, 0)),
                pl.BlockSpec((1, C2), lambda n, j: (0, 0)),
                pl.BlockSpec((1, 1), lambda n, j: (0, 0)),
            ],
            out_specs=pl.BlockSpec((1, C, tile_hw), lambda n, j: (n, 0, j)),
        ),
        compiler_params=pltpu.CompilerParams(
            # Every grid step writes a disjoint output block -> both axes are
            # parallel; on v7x this shards the loop across the 2 TensorCores
            # (no-op on single-TC v5e/v6e).
            dimension_semantics=("parallel", "parallel"),
            vmem_limit_bytes=vmem_limit_bytes,
        ),
        # Optionally alias x's HBM buffer with the output when the caller no
        # longer needs x (avoids doubling peak HBM for large feature maps).
        input_output_aliases={0: 0} if donate_x else {},
    )(x3, w1_k, b1_k, w2_k, b2_k)

    if pad:
        out3 = out3[:, :, :HW]
    return out3.reshape(N, C, H, W)


def _reference(x_nchw, w1, b1, w2, b2):
    """Pure-JAX reference mirroring the PyTorch forward exactly."""
    h = jnp.einsum("nchw,oc->nohw", x_nchw, w1) + b1[None, :, None, None]
    h = jax.nn.relu(h)
    a = jnp.einsum("nchw,oc->nohw", h, w2) + b2[None, :, None, None]
    a = jax.nn.sigmoid(a)  # (N, 1, H, W)
    return x_nchw * a


if __name__ == "__main__":
    key = jax.random.PRNGKey(0)
    N, C, H, W = 2, 4, 16, 16
    C2 = C // 2

    k_x, k_w1, k_b1, k_w2, k_b2 = jax.random.split(key, 5)
    x = jax.random.normal(k_x, (N, C, H, W), dtype=jnp.float32)
    # Deterministic synthetic "conv" parameters (1x1 kernels, spatial dims squeezed).
    w1 = jax.random.normal(k_w1, (C2, C), dtype=jnp.float32) * 0.5
    b1 = jax.random.normal(k_b1, (C2,), dtype=jnp.float32) * 0.1
    w2 = jax.random.normal(k_w2, (1, C2), dtype=jnp.float32) * 0.5
    b2 = jax.random.normal(k_b2, (1,), dtype=jnp.float32) * 0.1

    out = jax.block_until_ready(attention_module(x, w1, b1, w2, b2))
    ref = jax.block_until_ready(_reference(x, w1, b1, w2, b2))

    assert out.shape == (N, C, H, W)
    assert jnp.allclose(out, ref, atol=1e-5, rtol=1e-5)

    print("KERNEL_OK")
</pallas_src>

<mosaic_0001>
module attributes {stable_mosaic.version = 11 : i64} {
  func.func @_attention_kernel(%arg0: i32, %arg1: i32, %arg2: memref<1x4x256xf32, #tpu.memory_space<vmem>>, %arg3: memref<2x4xf32, #tpu.memory_space<vmem>>, %arg4: memref<2x1xf32, #tpu.memory_space<vmem>>, %arg5: memref<1x2xf32, #tpu.memory_space<vmem>>, %arg6: memref<1x1xf32, #tpu.memory_space<vmem>>, %arg7: memref<1x4x256xf32, #tpu.memory_space<vmem>>) attributes {dimension_semantics = [#tpu.dimension_semantics<parallel>, #tpu.dimension_semantics<parallel>], iteration_bounds = array<i64: 2, 1>, scalar_prefetch = 0 : i64, scratch_operands = 0 : i64, tpu.core_type = #tpu.core_type<tc>, window_params = [{transform_indices = @transform_0, window_bounds = array<i64: 1, 4, 256>}, {pipeline_mode = #tpu.pipeline_mode<synchronous>, transform_indices = @transform_1, window_bounds = array<i64: 2, 4>}, {pipeline_mode = #tpu.pipeline_mode<synchronous>, transform_indices = @transform_2, window_bounds = array<i64: 2, 1>}, {pipeline_mode = #tpu.pipeline_mode<synchronous>, transform_indices = @transform_3, window_bounds = array<i64: 1, 2>}, {pipeline_mode = #tpu.pipeline_mode<synchronous>, transform_indices = @transform_4, window_bounds = array<i64: 1, 1>}, {transform_indices = @transform_5, window_bounds = array<i64: 1, 4, 256>}]} {
    %c0 = arith.constant 0 : index
    %c0_0 = arith.constant 0 : index
    %c0_1 = arith.constant 0 : index
    %0 = vector.load %arg2[%c0, %c0_0, %c0_1] : memref<1x4x256xf32, #tpu.memory_space<vmem>>, vector<1x4x256xf32>
    %1 = vector.shape_cast %0 : vector<1x4x256xf32> to vector<4x256xf32>
    %c0_2 = arith.constant 0 : index
    %c0_3 = arith.constant 0 : index
    %2 = vector.load %arg3[%c0_2, %c0_3] : memref<2x4xf32, #tpu.memory_space<vmem>>, vector<2x4xf32>
    %cst = arith.constant dense<0.000000e+00> : vector<2x256xf32>
    %3 = tpu.matmul %2, %1, %cst {dimension_numbers = #tpu.dot_dimension_numbers<[1], [0], [0], [1], [0, 0, 1, 1], [], []>} : vector<2x4xf32>, vector<4x256xf32>, vector<2x256xf32> -> vector<2x256xf32>
    %c0_4 = arith.constant 0 : index
    %c0_5 = arith.constant 0 : index
    %4 = vector.load %arg4[%c0_4, %c0_5] : memref<2x1xf32, #tpu.memory_space<vmem>>, vector<2x1xf32>
    %5 = vector.broadcast %4 : vector<2x1xf32> to vector<2x256xf32>
    %6 = arith.addf %3, %5 : vector<2x256xf32>
    %cst_6 = arith.constant 0.000000e+00 : f32
    %7 = vector.broadcast %cst_6 : f32 to vector<2x256xf32>
    %8 = arith.maximumf %6, %7 : vector<2x256xf32>
    %c0_7 = arith.constant 0 : index
    %c0_8 = arith.constant 0 : index
    %9 = vector.load %arg5[%c0_7, %c0_8] : memref<1x2xf32, #tpu.memory_space<vmem>>, vector<1x2xf32>
    %cst_9 = arith.constant dense<0.000000e+00> : vector<1x256xf32>
    %10 = tpu.matmul %9, %8, %cst_9 {dimension_numbers = #tpu.dot_dimension_numbers<[1], [0], [0], [1], [0, 0, 1, 1], [], []>} : vector<1x2xf32>, vector<2x256xf32>, vector<1x256xf32> -> vector<1x256xf32>
    %c0_10 = arith.constant 0 : index
    %c0_11 = arith.constant 0 : index
    %11 = vector.load %arg6[%c0_10, %c0_11] : memref<1x1xf32, #tpu.memory_space<vmem>>, vector<1x1xf32>
    %12 = vector.broadcast %11 : vector<1x1xf32> to vector<1x256xf32>
    %13 = arith.addf %10, %12 : vector<1x256xf32>
    %14 = arith.negf %13 : vector<1x256xf32>
    %15 = math.exp %14 : vector<1x256xf32>
    %cst_12 = arith.constant 1.000000e+00 : f32
    %16 = vector.broadcast %cst_12 : f32 to vector<1x256xf32>
    %17 = arith.addf %16, %15 : vector<1x256xf32>
    %18 = arith.divf %16, %17 : vector<1x256xf32>
    %19 = vector.broadcast %18 : vector<1x256xf32> to vector<4x256xf32>
    %20 = arith.mulf %1, %19 : vector<4x256xf32>
    %c0_13 = arith.constant 0 : index
    %c0_14 = arith.constant 0 : index
    %c0_15 = arith.constant 0 : index
    %21 = vector.load %arg7[%c0_13, %c0_14, %c0_15] : memref<1x4x256xf32, #tpu.memory_space<vmem>>, vector<1x4x256xf32>
    %22 = vector.shape_cast %21 : vector<1x4x256xf32> to vector<4x256xf32>
    %23 = vector.shape_cast %20 : vector<4x256xf32> to vector<1x4x256xf32>
    tpu.vector_store %arg7[%c0_13, %c0_14, %c0_15], %23 {strides = array<i32>} : memref<1x4x256xf32, #tpu.memory_space<vmem>>, vector<1x4x256xf32>,
    return
  }
  func.func @transform_0(%arg0: i32, %arg1: i32) -> (i32, i32, i32) {
    %c0_i32 = arith.constant 0 : i32
    %c0_i32_0 = arith.constant 0 : i32
    return %arg0, %c0_i32, %arg1 : i32, i32, i32
  }
  func.func @transform_1(%arg0: i32, %arg1: i32) -> (i32, i32) {
    %c0_i32 = arith.constant 0 : i32
    %c0_i32_0 = arith.constant 0 : i32
    %c0_i32_1 = arith.constant 0 : i32
    return %c0_i32, %c0_i32_0 : i32, i32
  }
  func.func @transform_2(%arg0: i32, %arg1: i32) -> (i32, i32) {
    %c0_i32 = arith.constant 0 : i32
    %c0_i32_0 = arith.constant 0 : i32
    %c0_i32_1 = arith.constant 0 : i32
    return %c0_i32, %c0_i32_0 : i32, i32
  }
  func.func @transform_3(%arg0: i32, %arg1: i32) -> (i32, i32) {
    %c0_i32 = arith.constant 0 : i32
    %c0_i32_0 = arith.constant 0 : i32
    %c0_i32_1 = arith.constant 0 : i32
    return %c0_i32, %c0_i32_0 : i32, i32
  }
  func.func @transform_4(%arg0: i32, %arg1: i32) -> (i32, i32) {
    %c0_i32 = arith.constant 0 : i32
    %c0_i32_0 = arith.constant 0 : i32
    %c0_i32_1 = arith.constant 0 : i32
    return %c0_i32, %c0_i32_0 : i32, i32
  }
  func.func @transform_5(%arg0: i32, %arg1: i32) -> (i32, i32, i32) {
    %c0_i32 = arith.constant 0 : i32
    %c0_i32_0 = arith.constant 0 : i32
    return %arg0, %c0_i32, %arg1 : i32, i32, i32
  }
}

</mosaic_0001>

<bundles_post_ra>
// kernel: tpu_custom_call.1
= control target key start
LH: loop header
LB: loop body
LE: loop exit
PB: predicated region body
PF: predicated region fallthrough
CT: control target
= control target key end

     0   :  { %s968_s0 = inlined_call_operand.hbm [shape: f32[2,4,256], index: 0, kind: input, shape index: {}]   ;;  %s969_s1 = inlined_call_operand.vmem [shape: f32[2,4], index: 1, kind: input, shape index: {}]   ;;  %s970_s2 = inlined_call_operand.vmem [shape: f32[2,1], index: 2, kind: input, shape index: {}]   ;;  %s971_s3 = inlined_call_operand.vmem [shape: f32[1,2], index: 3, kind: input, shape index: {}]   ;;  %s972_s4 = inlined_call_operand.<no memory space> [shape: f32[1,1], index: 4, kind: input, shape index: {}]   ;;  %s973_s5 = inlined_call_operand.hbm [shape: f32[2,4,256], index: 5, kind: output, shape index: {}]  }
   0x1   :  { %v10_v0 = vstv %s972_s4 }
   0x2   :  { %11 = vst [vmem:[#allocation2] sm:$0x1] %v10_v0 }
   0x3   :  { %12 = vsyncpa [#allocation4], 0 }
   0x4   :  { %14 = vsyncpa [#allocation4 + $0x1], 0 }
   0x5   :  { %15 = vsyncpa [#allocation5], 0 }
   0x6   :  { %17 = vsyncpa [#allocation5 + $0x1], 0  ;;  %s821_s20 = smov 0   ;;  %s823_s21 = smov 0  }
   0x7   :  { %s825_s22 = smov 0   ;;  %s827_s23 = smov 0  }
   0x8   :  { %s829_s24 = smov 0   ;;  %s831_s25 = smov 0  }
   0x9 LB: > { %s575_s4 = sadd.s32 4294967295, %s782_s25   ;;  %s576_s26 = sadd.s32 4294967294, %s782_s25   ;;  %s782_s25 = sphi %s831_s25, %s23_s25   ;;  %s778_s24 = sphi %s829_s24, %s985_s24   ;;  %s774_s23 = sphi %s827_s23, %s984_s23   ;;  %s770_s22 = sphi %s825_s22, %s983_s22   ;;  %s766_s21 = sphi %s823_s21, %s982_s21   ;;  %s762_s20 = sphi %s821_s20, %s981_s20  }
   0xa   : > { %s35_s27 = sadd.s32 1, %s778_s24  ;;  %s44_s28 = sadd.s32 1, %s770_s22 }
   0xb   : > { %p37_p0 = scmp.ge.s32.totalorder %s35_s27, 2  ;;  %p51_p1 = scmp.ne.s32.totalorder %s770_s22, %s766_s21 }
   0xc   : > { %p52_p2 = scmp.eq.s32.totalorder %s782_s25, 0  ;;  %p57_p3 = scmp.ne.s32.totalorder %s766_s21, %s762_s20 }
   0xd   : > { %s987_s27 = smov (%p37_p0, %s35_s27), 0  ;;  %p58_p5 = scmp.eq.s32.totalorder %s575_s4, 0 }
   0xe   : > { %p862_p4 = por %p52_p2, %p51_p1  ;;  %s39_s30 = ssub.s32 %s778_s24, %s987_s27 }
   0xf   : > { %p167_p6 = scmp.eq.s32.totalorder %s575_s4, 1  ;;  %p42_p7 = scmp.eq.s32.totalorder %s39_s30, 0 }
  0x10   : > { %p868_p8 = por %p58_p5, %p57_p3  ;;  %p173_p10 = scmp.eq.s32.totalorder %s576_s26, 1 }
  0x11   : > { %p872_p9 = por %p167_p6, %p51_p1  ;;  %p612_p13 = scmp.lt.s32.totalorder %s782_s25, 2 }
  0x12   : > { %s877_s8 = scalar_select %p42_p7, %s770_s22, %s44_s28  }
  0x13   : > { %p879_p11 = por %p173_p10, %p57_p3  ;;  %s205_s10 = sand.u32 1, %s770_s22  }
  0x14   : > { %s579_s11 = sshll.u32 %s205_s10, 3  ;;  %s598_s12 = sshll.u32 %s778_s24, 7 }
  0x15   : > { %s977_s9 = scalar_select %p879_p11, 1, 0 }
  0x16   : > { %s217_s15 = scalar_lea.hbm %s968_s0, %s598_s12  ;;  %s209_s16 = scalar_lea.vmem [#allocation3], %s579_s11 }
  0x17   : > { %s219_s17 = sshll.u32 %s209_s16, 4  ;;  %p892_p0 = pnand %p612_p13, %p862_p4  ;;  %s220_s17 = int_to_ptr.vmem [resolvable:$true] %s219_s17 }
  0x18   : > { %p582_p1 = scmp.ge.s32.totalorder %s782_s25, 1  ;;  %p224_p2 = scmp.lt.s32.totalorder %s782_s25, 3 }
  0x19   : > { %s206_s19 = scalar_lea.sflag [#allocation4], %s205_s10  ;;  %p676_p3 = pneg %p892_p0 }
  0x1a   : > { %s687_s4 = scalar_lea.vmem %s220_s17, 128  ;;  %s784_s26 = smov [#allocation3]  }
  0x1b   : > { %p688_p5 = scmp.ne.s32.totalorder %s220_s17, %s687_s4  ;;  %s692_s28 = sshll.u32 %s784_s26, 4  ;;  %s693_s28 = int_to_ptr.vmem [resolvable:$false] %s692_s28 }
  0x1c   : > { %s694_s30 = scalar_lea.vmem %s693_s28, 256  ;;  %p695_p10 = scmp.lt.s32.totalorder %s220_s17, %s693_s28 }
  0x1d   : > { %p690_p6 = pnand %p688_p5, %p676_p3  ;;  %p696_p12 = scmp.lt.s32.totalorder %s694_s30, %s687_s4 }
  0x1f   : > { %p691_p7 = pneg %p690_p6  ;;  %p697_p4 = por %p696_p12, %p695_p10 }
  0x21   : > { %p698_p13 = pnand %p697_p4, %p691_p7 }
  0x23   : > { %701 = shalt.err (!%p698_p13)
}
  0x24   : > { %607 = dma.hbm_to_vmem [thread:$0]  (!%p892_p0), %s217_s15, 128, %s220_s17, %s206_s19  }
  0x25   : > { %p225_p11 = pnand %p582_p1, %p224_p2 }
  0x26   : > { %s907_s29 = sand.u32 (!%p225_p11), 1, %s766_s21  }
  0x27   : > { %228 = sbr.rel (%p225_p11) target bundleno = 499 (0x1f3), region = 40  ;;  %s583_s10 = sshll.u32 (!%p225_p11), %s907_s29, 3 }
  0x28   : > { %s231_s11 = scalar_lea.sflag (!%p225_p11), [#allocation4], %s907_s29  ;;  %s234_s12 = scalar_lea.vmem (!%p225_p11), [#allocation3], %s583_s10 }
  0x2c   : > { %753 = dma.done.wait (%p868_p8), %s231_s11, 128  }
  0x2d   : > { %755 = vsyncadd (%p868_p8), %s231_s11, 4294967168  ;;  %v785_v1 = vmov 0.0   ;;  %v786_v2 = vmov 0   ;;  %v263_v3 = vld [vmem:[%s234_s12] sm:$0xff]  ;;  %vm277_vm0 = vcmask 1043456   ;;  %vm273_vm1 = vcmask 31744  }
  0x2e   : > { %346 = vmatprep.mubr.f32.mxu0 %v785_v1  ;;  %664 = vset.pattern.permute.xlu0 %v786_v2  ;;  %v265_v4 = vld [vmem:[%s970_s2] sm:$0x3]  ;;  %v272_v5 = vcombine.high %v263_v3, %v263_v3  ;;  %vm370_vm2 = vcmask 1041408   ;;  %vm366_vm3 = vcmask 15360   ;;  %v362_v16 = vlaneseq  ;;  %s599_s18 = sshll.u32 %s774_s23, 7  ;;  %s260_s19 = scalar_lea.vmem [#allocation6], %s583_s10 }
  0x2f   : > { %441 = vmatprep.mubr.f32.mxu1 %v785_v1  ;;  %268 = vperm.xlu0 %664, %v265_v4   ;;  %v264_v6 = vld [vmem:[%s969_s1] sm:$0x3]  ;;  %s491_s4 = sshll.u32 %s260_s19, 4  ;;  %s489_s30 = scalar_lea.hbm %s973_s5, %s599_s18  ;;  %s492_s4 = int_to_ptr.vmem [resolvable:$true] %s491_s4 }
  0x30   : > { %v356_v7 = vld [vmem:[#allocation2] sm:$0x1]  ;;  %585 = vmatprep.subr.msk.mxu0 %vm277_vm0, %v272_v5  ;;  %v363_v17 = vshrl.u32 %v362_v16, 7  ;;  %s475_s11 = scalar_lea.sflag [#allocation5], %s907_s29  ;;  %s702_s12 = scalar_lea.vmem %s492_s4, 128 }
  0x31   : > { %586 = vmatpush1.msk.msra.mxu0 %vm277_vm0, %v263_v3  ;;  %v355_v15 = vld [vmem:[%s971_s3] sm:$0x1]  ;;  %p703_p8 = scmp.ne.s32.totalorder %s492_s4, %s702_s12  ;;  %s787_s13 = smov [#allocation6]  }
  0x32   : > { %587 = vmatmul.mubr.msk.f32.vlgmr.msra.gmra.mxu0 %vm273_vm1, %v264_v6  ;;  %v364_v18 = vsub.s32 0, %v363_v17  ;;  %s706_s14 = sshll.u32 %s787_s13, 4  ;;  %s707_s14 = int_to_ptr.vmem [resolvable:$false] %s706_s14 }
  0x33   : > { %359 = vperm.xlu0 %664, %v356_v7   ;;  %p704_p11 = pnand %p703_p8, %p872_p9  ;;  %s708_s23 = scalar_lea.vmem %s707_s14, 256 }
  0x34   : > { %p709_p0 = scmp.lt.s32.totalorder %s492_s4, %s707_s14  ;;  %p710_p1 = scmp.lt.s32.totalorder %s708_s23, %s702_s12 }
  0x35   : > { %p705_p12 = pneg %p704_p11 }
  0x36   : > { %p711_p2 = por %p710_p1, %p709_p0 }
  0x38   : > { %p712_p3 = pnand %p711_p2, %p705_p12 }
  0xaa   : > { %v269_v9 = vpop.permute.xlu0 %268 }
  0xae   : > { %v360_v19 = vpop.permute.xlu0 %359 }
  0xaf   : > { %v365_v20 = vrot.slane %v360_v19, %v364_v18 }
  0xf2   : > { %v348_v8 = vpop.f32.mrf.mxu0 }
  0xf3   : > { %v349_v10 = vadd.f32 %v348_v8, %v269_v9 }
  0xf4   : > { %v350_v11 = vpop.f32.mrf.mxu0 }
  0xf5   : > { %v351_v12 = vadd.f32 %v350_v11, %v269_v9  ;;  %v353_v14 = vmax.f32 %v349_v10, 0.0 }
  0xf7   : > { %v354_v13 = vmax.f32 %v351_v12, 0.0 }
  0xf9   : > { %588 = vmatprep.subr.msk.mxu1 %vm370_vm2, %v354_v13 }
  0xfa   : > { %589 = vmatpush1.msk.msra.mxu1 %vm370_vm2, %v353_v14 }
  0xfb   : > { %590 = vmatmul.mubr.msk.f32.vlgmr.msra.gmra.mxu1 %vm366_vm3, %v355_v15 }
 0x1bb   : > { %v443_v21 = vpop.f32.mrf.mxu1 }
 0x1bc   : > { %v444_v22 = vadd.f32 %v443_v21, %v365_v20 }
 0x1bd   : > { %v445_v23 = vpop.f32.mrf.mxu1 }
 0x1be   : > { %v591_v24 = vmul.f32 -1.442695, %v444_v22  ;;  %v446_v25 = vadd.f32 %v445_v23, %v365_v20 }
 0x1c0   : > { %666 = vpow2.f32 %v591_v24  ;;  %v592_v26 = vmul.f32 -1.442695, %v446_v25 }
 0x1c2   : > { %668 = vpow2.f32 %v592_v26 }
 0x1cd   : > { %v667_v27 = vpop.eup %666 }
 0x1ce   : > { %v454_v28 = vadd.f32 1.0, %v667_v27 }
 0x1cf   : > { %v669_v29 = vpop.eup %668 }
 0x1d0   : > { %670 = vrcp.f32 %v454_v28  ;;  %v455_v30 = vadd.f32 1.0, %v669_v29 }
 0x1d2   : > { %672 = vrcp.f32 %v455_v30 }
 0x1dd   : > { %v671_v31 = vpop.eup %670 }
 0x1de   : > { %v463_v33 = vrot.slane %v671_v31, %v364_v18 }
 0x1df   : > { %v673_v32 = vpop.eup %672 }
 0x1e0   : > { %v467_v34 = vrot.slane %v673_v32, %v364_v18 }
 0x1e2   : > { %v470_v35 = vcombine.low %v463_v33, %v467_v34 }
 0x1e4   : > { %v472_v36 = vmul.f32 %v470_v35, %v263_v3 }
 0x1e6   : > { %473 = vst [vmem:[%s260_s19] sm:$0xff] %v472_v36 }
 0x1e7   : > { %715 = shalt.err (!%p712_p3)
}
 0x1e8   : > { %s716_s10 = scalar_lea.hbm %s489_s30, 128  ;;  %s720_s16 = scalar_lea.hbm %s973_s5, 256 }
 0x1e9   : > { %p717_p5 = scmp.ne.s32.totalorder %s489_s30, %s716_s10  ;;  %p721_p10 = scmp.lt.s32.totalorder %s489_s30, %s973_s5 }
 0x1ea   : > { %p722_p4 = scmp.lt.s32.totalorder %s720_s16, %s716_s10 }
 0x1eb   : > { %p718_p6 = pnand %p717_p5, %p872_p9 }
 0x1ec   : > { %p723_p13 = por %p722_p4, %p721_p10 }
 0x1ed   : > { %p719_p7 = pneg %p718_p6 }
 0x1ef   : > { %p724_p8 = pnand %p723_p13, %p719_p7 }
 0x1f1   : > { %727 = shalt.err (!%p724_p8)
}
 0x1f2   : > { %602 = dma.vmem_to_hbm [thread:$0]  (%p872_p9), %s492_s4, 128, %s489_s30, %s475_s11  }
 0x1f3 PF: > { %s503_s18 = sand.u32 1, %s762_s20   ;;  %p979_p11 = scmp.ne.s32.totalorder %s977_s9, 0 }
 0x1f4   : > { %p980_p12 = scmp.ge.s32.totalorder %s782_s25, 2  ;;  %s504_s19 = scalar_lea.sflag [#allocation5], %s503_s18 }
 0x1f6   : > { %p609_p0 = pnand %p980_p12, %p979_p11 }
 0x1f8   : > { %p610_p1 = pneg %p609_p0 }
 0x1fa   : > { %757 = dma.done.wait (%p610_p1), %s504_s19, 128  }
 0x1fb   : > { %759 = vsyncadd (%p610_p1), %s504_s19, 4294967168  ;;  %s23_s25 = sadd.s32 1, %s782_s25   ;;  %s981_s20 = smov %s766_s21 }
 0x1fc   : > { %p20_p2 = scmp.ge.s32.totalorder %s23_s25, 4   ;;  %s982_s21 = smov %s770_s22 }
 0x1fd   : > { %s983_s22 = smov %s877_s8  ;;  %s984_s23 = smov %s778_s24 }
 0x1fe   : > { %s985_s24 = smov %s987_s27  ;;  %22 = sbr.rel (!%p20_p2) target bundleno = 9 (0x9), region = 85 }
 0x203   :  { %509 = vsyncpa [#allocation4], 1 }
 0x204   :  { %511 = vsyncpa [#allocation4 + $0x1], 1 }
 0x205   :  { %512 = vsyncpa [#allocation5], 1 }
 0x206   :  { %514 = vsyncpa [#allocation5 + $0x1], 1 }

</bundles_post_ra>
